<compile_context>
chip_gen: v7x
topology: tpu7x:2x2x1
jax: 0.10.0
libtpu: 0.0.40
codegen_flags: <defaults>
</compile_context>

<pallas_src>
import jax
import jax.numpy as jnp
from jax.experimental import pallas as pl
from jax.experimental.pallas import tpu as pltpu


def _frozen_bn_kernel(x_ref, scale_ref, shift_ref, o_ref):
    # x_ref: (tile_rows, tile_cols) block.
    # scale_ref / shift_ref: (tile_rows, 1) OR (1, tile_cols) folded affine params,
    # broadcast by the VPU along the other axis. Pure FMA; hidden behind DMA.
    x = x_ref[...].astype(jnp.float32)
    o_ref[...] = (x * scale_ref[...] + shift_ref[...]).astype(o_ref.dtype)


def _tpu_defaults():
    """(target_block_bytes, vmem_limit_bytes, min_grid_blocks) per TPU generation."""
    kind = ""
    try:
        dev = jax.devices()[0]
        if dev.platform == "tpu":
            kind = dev.device_kind.lower()
    except Exception:
        pass
    if "7" in kind:
        # v7x: 2 TensorCores/chip, 64 MiB VMEM/TC -> 4 MiB blocks, >=2 parallel blocks.
        return 4 * 1024 * 1024, 48 * 1024 * 1024, 2
    if "v6" in kind:
        # v6e: 128 MiB VMEM, 32 MiB default scoped -> 4 MiB blocks + raised limit.
        return 4 * 1024 * 1024, 48 * 1024 * 1024, 1
    # v5e / unknown: 16 MiB default scoped limit -> 2 MiB blocks (~8 MiB footprint).
    return 2 * 1024 * 1024, None, 1


def _choose_tiles(rows, cols, itemsize, target_bytes, min_blocks):
    """Pick (tile_rows, tile_cols) for a (rows, cols) slab.

    tile_cols: multiple of 128 (lane-dense) or the full extent if cols < 128.
    tile_rows: multiple of the sublane packing (8 for f32, 16 for bf16) or the
               full extent. Grid uses pl.cdiv, so tiles need not divide extents;
               boundary blocks are masked by Pallas.
    """
    sublane = max(8, 32 // itemsize)          # 8 for f32, 16 for bf16

    if cols < 128:
        tile_cols = cols                       # full extent (legal block shape)
    else:
        tile_cols = min((cols // 128) * 128, 2048)

    tile_rows = max(
        sublane,
        (target_bytes // max(tile_cols * itemsize, 1)) // sublane * sublane)
    if tile_rows >= rows:
        tile_rows = rows                       # full extent (legal block shape)
        # Small row extent: re-grow the lane axis (beyond the 2048 cap) so the
        # block still reaches ~target_bytes -> fewer grid-step overheads.
        if cols >= 128:
            want_cols = (target_bytes // max(rows * itemsize, 1)) // 128 * 128
            tile_cols = min((cols // 128) * 128, max(tile_cols, want_cols))

    # v7x megacore: guarantee >= min_blocks blocks so both TensorCores get work.
    def n_blocks(tr, tc):
        return ((rows + tr - 1) // tr) * ((cols + tc - 1) // tc)

    while n_blocks(tile_rows, tile_cols) < min_blocks:
        half_tc = (tile_cols // 2) // 128 * 128
        half_tr = (tile_rows // 2) // sublane * sublane
        if half_tc >= 128:
            tile_cols = half_tc
        elif half_tr >= sublane:
            tile_rows = half_tr
        else:
            break                              # too small to split legally

    return tile_rows, tile_cols


def frozen_batch_norm_2d(x, weight, bias, running_mean, running_var, eps):
    """x: NCHW float array. weight/bias/running_mean/running_var: (C,)."""
    N, C, H, W = x.shape
    spatial = H * W

    # Fold the batch-norm affine once in f32 (tiny (C,) math, done by XLA
    # outside the kernel).
    w = weight.astype(jnp.float32)
    b = bias.astype(jnp.float32)
    m = running_mean.astype(jnp.float32)
    v = running_var.astype(jnp.float32)
    scale = w * jax.lax.rsqrt(v + jnp.float32(eps))          # (C,)
    shift = b - m * scale                                     # (C,)

    target_bytes, vmem_limit, min_blocks = _tpu_defaults()
    itemsize = x.dtype.itemsize

    # Layout choice (both reshapes are layout-preserving views of contiguous NCHW).
    per_row = spatial >= 512
    if per_row:
        # Large spatial: lanes = H*W, params are one scalar per (n, c) row.
        rows, cols = N * C, spatial
        scale_p = jnp.broadcast_to(scale[None, :], (N, C)).reshape(rows, 1)
        shift_p = jnp.broadcast_to(shift[None, :], (N, C)).reshape(rows, 1)
    else:
        # Small spatial: lanes = C*H*W so stores stay wide/unmasked; params are
        # per-lane (each channel's scalar repeated H*W times -> still tiny).
        rows, cols = N, C * spatial
        scale_p = jnp.repeat(scale, spatial).reshape(1, cols)
        shift_p = jnp.repeat(shift, spatial).reshape(1, cols)
    x2d = x.reshape(rows, cols)

    tile_rows, tile_cols = _choose_tiles(rows, cols, itemsize,
                                         target_bytes, min_blocks)

    if per_row:
        # Column axis INNERMOST: the (tile_rows, 1) param block index is constant
        # across consecutive steps, so Pallas skips the param re-DMA. Do not flip.
        grid = (pl.cdiv(rows, tile_rows), pl.cdiv(cols, tile_cols))
        x_spec = pl.BlockSpec((tile_rows, tile_cols), lambda i, j: (i, j))
        p_spec = pl.BlockSpec((tile_rows, 1), lambda i, j: (i, 0))
    else:
        # Param-varying (column) axis OUTERMOST: the (1, tile_cols) param block
        # index is constant across consecutive inner (row) steps -> no re-DMA.
        grid = (pl.cdiv(cols, tile_cols), pl.cdiv(rows, tile_rows))
        x_spec = pl.BlockSpec((tile_rows, tile_cols), lambda j, i: (i, j))
        p_spec = pl.BlockSpec((1, tile_cols), lambda j, i: (0, j))

    out2d = pl.pallas_call(
        _frozen_bn_kernel,
        out_shape=jax.ShapeDtypeStruct((rows, cols), x.dtype),
        grid_spec=pltpu.PrefetchScalarGridSpec(
            num_scalar_prefetch=0,
            grid=grid,
            in_specs=[x_spec, p_spec, p_spec],
            out_specs=x_spec,
        ),
        compiler_params=pltpu.CompilerParams(
            dimension_semantics=("parallel", "parallel"),
            vmem_limit_bytes=vmem_limit),
    )(x2d, scale_p, shift_p)

    # Layout-preserving view back to NCHW.
    return out2d.reshape(N, C, H, W)


if __name__ == "__main__":
    key = jax.random.PRNGKey(0)
    kx, kw, kb, km, kv = jax.random.split(key, 5)

    N, C, H, W = 2, 4, 16, 16
    eps = 1e-5

    x = jax.random.normal(kx, (N, C, H, W), dtype=jnp.float32)
    weight = jax.random.normal(kw, (C,), dtype=jnp.float32)
    bias = jax.random.normal(kb, (C,), dtype=jnp.float32)
    running_mean = jax.random.normal(km, (C,), dtype=jnp.float32)
    running_var = jax.random.uniform(kv, (C,), dtype=jnp.float32,
                                     minval=0.5, maxval=2.0)

    out = frozen_batch_norm_2d(x, weight, bias, running_mean, running_var, eps)
    out = jax.block_until_ready(out)

    # Pure-JAX reference (matches torch.batch_norm eval-mode semantics).
    ref_scale = weight / jnp.sqrt(running_var + eps)
    ref_shift = bias - running_mean * ref_scale
    ref = x * ref_scale[None, :, None, None] + ref_shift[None, :, None, None]
    assert out.shape == (N, C, H, W)
    assert jnp.allclose(out, ref, atol=1e-5, rtol=1e-5), "mismatch vs reference"

    # Also exercise the large-spatial (per-row params) path once.
    x_big = jax.random.normal(kx, (N, C, 32, 32), dtype=jnp.float32)
    out_big = jax.block_until_ready(
        frozen_batch_norm_2d(x_big, weight, bias, running_mean, running_var, eps))
    ref_big = (x_big * ref_scale[None, :, None, None]
               + ref_shift[None, :, None, None])
    assert jnp.allclose(out_big, ref_big, atol=1e-5, rtol=1e-5), "mismatch (big)"

    print("KERNEL_OK")
</pallas_src>

<mosaic_0001>
module attributes {stable_mosaic.version = 11 : i64} {
  func.func @_frozen_bn_kernel(%arg0: i32, %arg1: i32, %arg2: memref<2x1024xf32, #tpu.memory_space<vmem>>, %arg3: memref<1x1024xf32, #tpu.memory_space<vmem>>, %arg4: memref<1x1024xf32, #tpu.memory_space<vmem>>, %arg5: memref<2x1024xf32, #tpu.memory_space<vmem>>) attributes {dimension_semantics = [#tpu.dimension_semantics<parallel>, #tpu.dimension_semantics<parallel>], iteration_bounds = array<i64: 1, 1>, scalar_prefetch = 0 : i64, scratch_operands = 0 : i64, tpu.core_type = #tpu.core_type<tc>, window_params = [{transform_indices = @transform_0, window_bounds = array<i64: 2, 1024>}, {transform_indices = @transform_1, window_bounds = array<i64: 1, 1024>}, {transform_indices = @transform_2, window_bounds = array<i64: 1, 1024>}, {transform_indices = @transform_3, window_bounds = array<i64: 2, 1024>}]} {
    %c0 = arith.constant 0 : index
    %c0_0 = arith.constant 0 : index
    %0 = vector.load %arg2[%c0, %c0_0] : memref<2x1024xf32, #tpu.memory_space<vmem>>, vector<2x1024xf32>
    %c0_1 = arith.constant 0 : index
    %c0_2 = arith.constant 0 : index
    %1 = vector.load %arg3[%c0_1, %c0_2] : memref<1x1024xf32, #tpu.memory_space<vmem>>, vector<1x1024xf32>
    %2 = vector.broadcast %1 : vector<1x1024xf32> to vector<2x1024xf32>
    %3 = arith.mulf %0, %2 : vector<2x1024xf32>
    %c0_3 = arith.constant 0 : index
    %c0_4 = arith.constant 0 : index
    %4 = vector.load %arg4[%c0_3, %c0_4] : memref<1x1024xf32, #tpu.memory_space<vmem>>, vector<1x1024xf32>
    %5 = vector.broadcast %4 : vector<1x1024xf32> to vector<2x1024xf32>
    %6 = arith.addf %3, %5 : vector<2x1024xf32>
    %c0_5 = arith.constant 0 : index
    %c0_6 = arith.constant 0 : index
    %7 = vector.load %arg5[%c0_5, %c0_6] : memref<2x1024xf32, #tpu.memory_space<vmem>>, vector<2x1024xf32>
    tpu.vector_store %arg5[%c0_5, %c0_6], %6 {strides = array<i32>} : memref<2x1024xf32, #tpu.memory_space<vmem>>, vector<2x1024xf32>,
    return
  }
  func.func @transform_0(%arg0: i32, %arg1: i32) -> (i32, i32) {
    %c0_i32 = arith.constant 0 : i32
    return %arg1, %arg0 : i32, i32
  }
  func.func @transform_1(%arg0: i32, %arg1: i32) -> (i32, i32) {
    %c0_i32 = arith.constant 0 : i32
    %c0_i32_0 = arith.constant 0 : i32
    return %c0_i32, %arg0 : i32, i32
  }
  func.func @transform_2(%arg0: i32, %arg1: i32) -> (i32, i32) {
    %c0_i32 = arith.constant 0 : i32
    %c0_i32_0 = arith.constant 0 : i32
    return %c0_i32, %arg0 : i32, i32
  }
  func.func @transform_3(%arg0: i32, %arg1: i32) -> (i32, i32) {
    %c0_i32 = arith.constant 0 : i32
    return %arg1, %arg0 : i32, i32
  }
}

</mosaic_0001>

<bundles_post_ra>
// kernel: tpu_custom_call.1
= control target key start
LH: loop header
LB: loop body
LE: loop exit
PB: predicated region body
PF: predicated region fallthrough
CT: control target
= control target key end

     0   :  { %8 = vsyncpa [#allocation3], 0  ;;  %s386_s0 = inlined_call_operand.hbm [shape: f32[2,1024], index: 0, kind: input, shape index: {}]   ;;  %s387_s1 = inlined_call_operand.hbm [shape: f32[1,1024], index: 1, kind: input, shape index: {}]   ;;  %s388_s2 = inlined_call_operand.hbm [shape: f32[1,1024], index: 2, kind: input, shape index: {}]   ;;  %s389_s3 = inlined_call_operand.hbm [shape: f32[2,1024], index: 3, kind: output, shape index: {}]  }
   0x1   :  { %9 = vsyncpa [#allocation6], 0 }
   0x2   :  { %10 = vsyncpa [#allocation4], 0  ;;  %s313_s12 = smov [#allocation5]   ;;  %s314_s14 = smov [#allocation2]  }
   0x3   :  { %s27_s13 = sshll.u32 %s313_s12, 4  ;;  %s17_s15 = sshll.u32 %s314_s14, 4  ;;  %s28_s13 = int_to_ptr.vmem [resolvable:$true] %s27_s13  ;;  %s18_s15 = int_to_ptr.vmem [resolvable:$true] %s17_s15 }
   0x4   :  { %s219_s18 = scalar_lea.hbm %s387_s1, 128 }
   0x5   :  { %p220_p0 = scmp.ne.s32.totalorder %s387_s1, %s219_s18  ;;  %p223_p1 = scmp.lt.u32.totalorder %s219_s18, %s387_s1 }
   0x7   :  { %p225_p2 = pnand %p223_p1, %p220_p0 }
   0x9   :  { %228 = shalt.err (!%p225_p2)
}
   0xa   :  { %s229_s23 = scalar_lea.vmem %s28_s13, 128  ;;  %p234_p4 = scmp.lt.s32.totalorder %s28_s13, %s28_s13 }
   0xb   :  { %p230_p3 = scmp.ne.s32.totalorder %s28_s13, %s229_s23  ;;  %p235_p5 = scmp.lt.s32.totalorder %s229_s23, %s229_s23 }
   0xd   :  { %p236_p6 = por %p235_p5, %p234_p4 }
   0xf   :  { %p237_p7 = pnand %p236_p6, %p230_p3 }
  0x11   :  { %240 = shalt.err (!%p237_p7)
}
  0x12   :  { %30 = dma.hbm_to_vmem [thread:$0]  %s387_s1, 128, %s28_s13, [#allocation6]  }
  0x13   :  { %s241_s28 = scalar_lea.hbm %s386_s0, 256 }
  0x14   :  { %p242_p8 = scmp.ne.s32.totalorder %s386_s0, %s241_s28  ;;  %p245_p9 = scmp.lt.u32.totalorder %s241_s28, %s386_s0 }
  0x16   :  { %p247_p10 = pnand %p245_p9, %p242_p8 }
  0x18   :  { %250 = shalt.err (!%p247_p10)
}
  0x19   :  { %s251_s6 = scalar_lea.vmem %s18_s15, 256  ;;  %p256_p12 = scmp.lt.s32.totalorder %s18_s15, %s18_s15 }
  0x1a   :  { %p252_p11 = scmp.ne.s32.totalorder %s18_s15, %s251_s6  ;;  %p257_p13 = scmp.lt.s32.totalorder %s251_s6, %s251_s6 }
  0x1c   :  { %p258_p0 = por %p257_p13, %p256_p12 }
  0x1e   :  { %p259_p1 = pnand %p258_p0, %p252_p11 }
  0x20   :  { %262 = shalt.err (!%p259_p1)
}
  0x21   :  { %20 = dma.hbm_to_vmem [thread:$0]  %s386_s0, 256, %s18_s15, [#allocation3]  }
  0x22   :  { %s315_s8 = smov [#allocation7]   ;;  %s263_s12 = scalar_lea.hbm %s388_s2, 128 }
  0x23   :  { %s37_s9 = sshll.u32 %s315_s8, 4  ;;  %p264_p2 = scmp.ne.s32.totalorder %s388_s2, %s263_s12  ;;  %s38_s9 = int_to_ptr.vmem [resolvable:$true] %s37_s9 }
  0x24   :  { %p267_p3 = scmp.lt.u32.totalorder %s263_s12, %s388_s2 }
  0x26   :  { %p269_p4 = pnand %p267_p3, %p264_p2 }
  0x28   :  { %272 = shalt.err (!%p269_p4)
}
  0x29   :  { %s273_s18 = scalar_lea.vmem %s38_s9, 128  ;;  %p278_p6 = scmp.lt.s32.totalorder %s38_s9, %s38_s9 }
  0x2a   :  { %p274_p5 = scmp.ne.s32.totalorder %s38_s9, %s273_s18  ;;  %p279_p7 = scmp.lt.s32.totalorder %s273_s18, %s273_s18 }
  0x2c   :  { %p280_p8 = por %p279_p7, %p278_p6 }
  0x2e   :  { %p281_p9 = pnand %p280_p8, %p274_p5 }
  0x30   :  { %284 = shalt.err (!%p281_p9)
}
  0x31   :  { %40 = dma.hbm_to_vmem [thread:$0]  %s388_s2, 128, %s38_s9, [#allocation6]  }
  0x32   :  { %307 = dma.done.wait [#allocation3], 256  }
  0x33   :  { %308 = vsyncadd [#allocation3], 4294967040 }
  0x34   :  { %309 = dma.done.wait [#allocation6], 256  }
  0x35   :  { %310 = vsyncadd [#allocation6], 4294967040  ;;  %v54_v0 = vlaneseq  ;;  %v316_v1 = vmov 1983009808   ;;  %v52_v11 = vld [vmem:[#allocation5] sm:$0xff]  ;;  %v124_v13 = vld [vmem:[#allocation7] sm:$0xff] }
  0x36   :  { %v89_v2 = vunpack.c.l.s4 %v316_v1  ;;  %v50_v36 = vld [vmem:[#allocation2] sm:$0xff]  ;;  %v51_v49 = vld [vmem:[#allocation2 + $0x8] sm:$0xff]  ;;  %s317_s2 = smov [#allocation8]  }
  0x37   :  { %v55_v3 = vshrl.u32 %v54_v0, 7  ;;  %s204_s19 = sshll.u32 %s317_s2, 4  ;;  %s205_s19 = int_to_ptr.vmem [resolvable:$true] %s204_s19 }
  0x38   :  { %v90_v4 = vunpack.c.0.s8 %v89_v2  ;;  %s285_s20 = scalar_lea.vmem %s205_s19, 256  ;;  %p290_p11 = scmp.lt.s32.totalorder %s205_s19, %s205_s19 }
  0x39   :  { %v56_v5 = vsub.s32 0, %v55_v3  ;;  %v60_v6 = vsub.s32 1, %v55_v3  ;;  %v64_v7 = vsub.s32 2, %v55_v3  ;;  %v68_v8 = vsub.s32 3, %v55_v3  ;;  %p286_p10 = scmp.ne.s32.totalorder %s205_s19, %s285_s20  ;;  %p291_p12 = scmp.lt.s32.totalorder %s285_s20, %s285_s20 }
  0x3a   :  { %v72_v9 = vsub.s32 4, %v55_v3  ;;  %v76_v10 = vsub.s32 5, %v55_v3  ;;  %v93_v12 = vsub.s32 %v90_v4, %v55_v3  ;;  %v80_v14 = vsub.s32 6, %v55_v3 }
  0x3b   :  { %v84_v15 = vsub.s32 7, %v55_v3  ;;  %v57_v16 = vrot.slane %v52_v11, %v56_v5  ;;  %v61_v17 = vrot.slane %v52_v11, %v60_v6  ;;  %v65_v18 = vrot.slane %v52_v11, %v64_v7  ;;  %p292_p13 = por %p291_p12, %p290_p11 }
  0x3c   :  { %v69_v19 = vrot.slane %v52_v11, %v68_v8  ;;  %v129_v20 = vrot.slane %v124_v13, %v56_v5  ;;  %v133_v21 = vrot.slane %v124_v13, %v60_v6  ;;  %v137_v22 = vrot.slane %v124_v13, %v64_v7 }
  0x3d   :  { %v141_v23 = vrot.slane %v124_v13, %v68_v8  ;;  %v86_v24 = vcombine.low %v57_v16, %v61_v17  ;;  %v73_v26 = vrot.slane %v52_v11, %v72_v9  ;;  %v77_v27 = vrot.slane %v52_v11, %v76_v10  ;;  %p293_p0 = pnand %p292_p13, %p286_p10 }
  0x3e   :  { %v87_v25 = vcombine.low %v65_v18, %v69_v19  ;;  %v158_v28 = vcombine.low %v129_v20, %v133_v21  ;;  %v81_v30 = vrot.slane %v52_v11, %v80_v14  ;;  %v85_v31 = vrot.slane %v52_v11, %v84_v15 }
  0x3f   :  { %v159_v29 = vcombine.low %v137_v22, %v141_v23  ;;  %v94_v32 = vrot.slane %v86_v24, %v93_v12  ;;  %v103_v34 = vcombine.low %v73_v26, %v77_v27  ;;  %v145_v35 = vrot.slane %v124_v13, %v72_v9 }
  0x40   :  { %v101_v33 = vrot.slane %v87_v25, %v93_v12  ;;  %v166_v37 = vrot.slane %v158_v28, %v93_v12  ;;  %v104_v39 = vcombine.low %v81_v30, %v85_v31  ;;  %v149_v40 = vrot.slane %v124_v13, %v76_v10 }
  0x41   :  { %v173_v38 = vrot.slane %v159_v29, %v93_v12  ;;  %v111_v42 = vrot.slane %v103_v34, %v93_v12  ;;  %v153_v43 = vrot.slane %v124_v13, %v80_v14  ;;  %v157_v44 = vrot.slane %v124_v13, %v84_v15 }
  0x42   :  { %v102_v41 = vcombine.low %v94_v32, %v101_v33  ;;  %v118_v46 = vrot.slane %v104_v39, %v93_v12  ;;  %v175_v47 = vcombine.low %v145_v35, %v149_v40 }
  0x43   :  { %v174_v45 = vcombine.low %v166_v37, %v173_v38  ;;  %v176_v50 = vcombine.low %v153_v43, %v157_v44 }
  0x44   :  { %v122_v48 = vmul.f32 %v102_v41, %v50_v36  ;;  %v119_v51 = vcombine.low %v111_v42, %v118_v46  ;;  %v183_v52 = vrot.slane %v175_v47, %v93_v12 }
  0x45   :  { %v190_v54 = vrot.slane %v176_v50, %v93_v12 }
  0x46   :  { %v194_v53 = vadd.f32 %v174_v45, %v122_v48  ;;  %v123_v55 = vmul.f32 %v119_v51, %v51_v49 }
  0x47   :  { %v191_v56 = vcombine.low %v183_v52, %v190_v54 }
  0x48   :  { %196 = vst [vmem:[#allocation8] sm:$0xff] %v194_v53 }
  0x49   :  { %v195_v57 = vadd.f32 %v191_v56, %v123_v55 }
  0x4b   :  { %197 = vst [vmem:[#allocation8 + $0x8] sm:$0xff] %v195_v57 }
  0x4c   :  { %296 = shalt.err (!%p293_p0)
}
  0x4d   :  { %s297_s23 = scalar_lea.hbm %s389_s3, 256 }
  0x4e   :  { %p298_p1 = scmp.ne.s32.totalorder %s389_s3, %s297_s23  ;;  %p301_p2 = scmp.lt.u32.totalorder %s297_s23, %s389_s3 }
  0x50   :  { %p303_p3 = pnand %p301_p2, %p298_p1 }
  0x52   :  { %306 = shalt.err (!%p303_p3)
}
  0x53   :  { %207 = dma.vmem_to_hbm [thread:$0]  %s205_s19, 256, %s389_s3, [#allocation4]  }
  0x54   :  { %311 = dma.done.wait [#allocation4], 256  }
  0x55   :  { %312 = vsyncadd [#allocation4], 4294967040 }
  0x56   :  { %211 = vsyncpa [#allocation3], 1 }
  0x57   :  { %212 = vsyncpa [#allocation6], 1 }
  0x58   :  { %213 = vsyncpa [#allocation4], 1 }

</bundles_post_ra>
